<compile_context>
chip_gen: v7x
topology: tpu7x:2x2x1
jax: 0.10.0
libtpu: 0.0.40
codegen_flags: <defaults>
</compile_context>

<pallas_src>
import math
from functools import partial

import jax
import jax.numpy as jnp
from jax.experimental import pallas as pl
from jax.experimental.pallas import tpu as pltpu

_LN2 = math.log(2.0)


def _round_up(x, m):
    return ((x + m - 1) // m) * m


def _ce_gauss_kernel(pred_ref, tgt_ref, out_ref, acc_ref, *,
                     blur_range, decay_scale, n_valid, tile_n):
    i = pl.program_id(1)                          # row-block index within this core slice

    @pl.when(i == 0)
    def _():
        acc_ref[...] = jnp.zeros_like(acc_ref)

    pred = pred_ref[...].astype(jnp.float32)      # (tile_n, C), upcast in VMEM
    tgt = tgt_ref[...]                            # (tile_n, 1) int32

    # --- log_softmax pieces; logp = z - lse is folded into the loss below ---
    m = jnp.max(pred, axis=-1, keepdims=True)
    z = pred - m
    lse = jnp.log(jnp.sum(jnp.exp(z), axis=-1, keepdims=True))   # (tile_n, 1)

    # --- gaussian-smoothed one-hot weights ---
    cls = jax.lax.broadcasted_iota(jnp.int32, pred.shape, 1)     # class ids
    dist = jnp.abs(cls - tgt)                                    # (tile_n, C)
    dist_f = dist.astype(jnp.float32)
    # decay(d) = exp(-2^d / (2*2^sigma)); 2^d via exp(ln2*d), both on the EUP.
    w_blur = jnp.exp(decay_scale * jnp.exp(dist_f * _LN2))
    weights = jnp.where(dist == 0, jnp.float32(1.0),
                        jnp.where(dist <= blur_range, w_blur, jnp.float32(0.0)))

    # --- per-row loss: -sum_j (z - lse) * w = lse * sum(w) - sum(z * w) ---
    w_sum = jnp.sum(weights, axis=-1, keepdims=True)
    zw_sum = jnp.sum(z * weights, axis=-1, keepdims=True)
    row_loss = lse * w_sum - zw_sum               # (tile_n, 1)

    # Mask rows beyond the real row count (partial trailing block, and the
    # clamped duplicate block on the second core when the block count is odd).
    block = pl.program_id(0) * pl.num_programs(1) + i
    row_idx = block * tile_n + jax.lax.broadcasted_iota(jnp.int32, (tile_n, 1), 0)
    acc_ref[...] += jnp.where(row_idx < n_valid, row_loss, jnp.float32(0.0))

    @pl.when(i == pl.num_programs(1) - 1)
    def _():
        out_ref[...] = jnp.sum(acc_ref[...], keepdims=True).reshape(1, 1, 1)


def cross_entropy_gaussian_smoothed(prediction, target, *,
                                    num_classes=722, blur_range=3, tile_n=512):
    B, T, C = prediction.shape
    assert C == num_classes
    N = B * T

    # Keep the caller's dtype (e.g. bf16) in HBM; the kernel upcasts in VMEM.
    pred2 = prediction.reshape(N, C)
    tgt2 = target.reshape(N, 1).astype(jnp.int32)

    # Effective row tile: large enough to amortize per-step overhead, no larger
    # than the (16-rounded) problem; multiple of 16 keeps bf16 packing legal.
    tn = min(tile_n, _round_up(N, 16))
    tn = max(16, tn - tn % 16)

    total_blocks = pl.cdiv(N, tn)
    # Split row blocks across (up to) 2 TensorCores (v7x); serial elsewhere.
    num_splits = 2 if total_blocks >= 2 else 1
    bpc = pl.cdiv(total_blocks, num_splits)       # row blocks per core slice

    decay_scale = -1.0 / (2.0 * 2.0 ** 1)         # sigma = 1  ->  -0.25

    kernel = partial(_ce_gauss_kernel, blur_range=blur_range,
                     decay_scale=decay_scale, n_valid=N, tile_n=tn)

    def row_block_map(c, i):
        # Clamp so the possibly out-of-range last block of the second core
        # re-reads a valid block; its rows are fully masked inside the kernel.
        return (jnp.minimum(c * bpc + i, total_blocks - 1), 0)

    partial_sums = pl.pallas_call(
        kernel,
        out_shape=jax.ShapeDtypeStruct((num_splits, 1, 1), jnp.float32),
        grid_spec=pltpu.PrefetchScalarGridSpec(
            num_scalar_prefetch=0,
            grid=(num_splits, bpc),
            in_specs=[
                pl.BlockSpec((tn, C), row_block_map),
                pl.BlockSpec((tn, 1), row_block_map),
            ],
            out_specs=pl.BlockSpec((1, 1, 1), lambda c, i: (c, 0, 0)),
            scratch_shapes=[pltpu.VMEM((tn, 1), jnp.float32)],
        ),
        compiler_params=pltpu.CompilerParams(
            dimension_semantics=("parallel", "arbitrary")),
    )(pred2, tgt2)

    return jnp.sum(partial_sums) / jnp.float32(N)


def _reference_loss(prediction, target, *, num_classes=722, blur_range=3):
    """Plain-JAX reference emulating the torch scatter order exactly."""
    decays = [math.exp(-math.pow(2, d) / (2 * math.pow(2, 1)))
              for d in range(blur_range + 1)]
    logp = jax.nn.log_softmax(prediction, axis=-1)
    iota = jnp.arange(num_classes, dtype=jnp.int32)
    oh = jnp.zeros(target.shape + (num_classes,), jnp.float32)
    for dist in range(blur_range, -1, -1):
        for direction in (1, -1):
            idx = jnp.clip(target + direction * dist, 0, num_classes - 1)
            oh = jnp.where(iota[None, None, :] == idx[..., None],
                           jnp.float32(decays[dist]), oh)
    oh = jnp.where(iota[None, None, :] == target[..., None], jnp.float32(1.0), oh)
    return jnp.mean(-(logp * oh).sum(axis=-1))


if __name__ == "__main__":
    NUM_CLASSES = 722
    BLUR_RANGE = 3

    key = jax.random.PRNGKey(0)
    kp, kt, kp2, kt2 = jax.random.split(key, 4)

    # Case 1: tiny shapes (single block, single core slice).
    B, T = 2, 8
    prediction = jax.random.normal(kp, (B, T, NUM_CLASSES), dtype=jnp.float32)
    target = jax.random.randint(kt, (B, T), 0, NUM_CLASSES, dtype=jnp.int32)
    # exercise the clamp-at-boundary paths of the torch scatter
    target = target.at[0, 0].set(0).at[0, 1].set(1).at[1, 0].set(NUM_CLASSES - 1)

    loss = cross_entropy_gaussian_smoothed(
        prediction, target, num_classes=NUM_CLASSES, blur_range=BLUR_RANGE)
    loss = jax.block_until_ready(loss)
    ref = _reference_loss(prediction, target,
                          num_classes=NUM_CLASSES, blur_range=BLUR_RANGE)
    assert jnp.allclose(loss, ref, atol=1e-5, rtol=1e-5), (loss, ref)

    # Case 2: exercises the 2-way core split and the masked partial trailing
    # block (N=80 rows, tile 64 -> block 0 full on core 0, block 1 partial on
    # core 1).
    B2, T2 = 2, 40
    prediction2 = jax.random.normal(kp2, (B2, T2, NUM_CLASSES), dtype=jnp.float32)
    target2 = jax.random.randint(kt2, (B2, T2), 0, NUM_CLASSES, dtype=jnp.int32)
    loss2 = cross_entropy_gaussian_smoothed(
        prediction2, target2, num_classes=NUM_CLASSES, blur_range=BLUR_RANGE,
        tile_n=64)
    loss2 = jax.block_until_ready(loss2)
    ref2 = _reference_loss(prediction2, target2,
                           num_classes=NUM_CLASSES, blur_range=BLUR_RANGE)
    assert jnp.allclose(loss2, ref2, atol=1e-5, rtol=1e-5), (loss2, ref2)

    print("KERNEL_OK")
</pallas_src>

<mosaic_0001>
module attributes {stable_mosaic.version = 11 : i64} {
  func.func @_ce_gauss_kernel(%arg0: i32, %arg1: i32, %arg2: memref<16x722xf32, #tpu.memory_space<vmem>>, %arg3: memref<16x1xi32, #tpu.memory_space<vmem>>, %arg4: memref<1x1x1xf32, #tpu.memory_space<vmem>>, %arg5: memref<16x1xf32, #tpu.memory_space<vmem>>) attributes {dimension_semantics = [#tpu.dimension_semantics<parallel>, #tpu.dimension_semantics<arbitrary>], iteration_bounds = array<i64: 1, 1>, scalar_prefetch = 0 : i64, scratch_operands = 1 : i64, tpu.core_type = #tpu.core_type<tc>, window_params = [{transform_indices = @transform_0, window_bounds = array<i64: 16, 722>}, {transform_indices = @transform_1, window_bounds = array<i64: 16, 1>}, {transform_indices = @transform_2, window_bounds = array<i64: 1, 1, 1>}]} {
    %c0_i32 = arith.constant 0 : i32
    %0 = arith.cmpi eq, %arg1, %c0_i32 : i32
    %1 = arith.extui %0 : i1 to i32
    %c0_i32_0 = arith.constant 0 : i32
    %2 = arith.cmpi ne, %1, %c0_i32_0 : i32
    scf.if %2 {
      %cst_20 = arith.constant 0.000000e+00 : f32
      %55 = vector.broadcast %cst_20 : f32 to vector<16x1xf32>
      %c0_21 = arith.constant 0 : index
      %c0_22 = arith.constant 0 : index
      %56 = vector.load %arg5[%c0_21, %c0_22] : memref<16x1xf32, #tpu.memory_space<vmem>>, vector<16x1xf32>
      tpu.vector_store %arg5[%c0_21, %c0_22], %55 {strides = array<i32>} : memref<16x1xf32, #tpu.memory_space<vmem>>, vector<16x1xf32>,
    } else {
    }
    %c0 = arith.constant 0 : index
    %c0_1 = arith.constant 0 : index
    %3 = vector.load %arg2[%c0, %c0_1] : memref<16x722xf32, #tpu.memory_space<vmem>>, vector<16x722xf32>
    %c0_2 = arith.constant 0 : index
    %c0_3 = arith.constant 0 : index
    %4 = vector.load %arg3[%c0_2, %c0_3] : memref<16x1xi32, #tpu.memory_space<vmem>>, vector<16x1xi32>
    %cst = arith.constant dense<0xFF800000> : vector<16xf32>
    %5 = vector.multi_reduction <maximumf>, %3, %cst [1] : vector<16x722xf32> to vector<16xf32>
    %6 = vector.shape_cast %5 : vector<16xf32> to vector<16x1xf32>
    %7 = vector.broadcast %6 : vector<16x1xf32> to vector<16x722xf32>
    %8 = arith.subf %3, %7 : vector<16x722xf32>
    %9 = math.exp %8 : vector<16x722xf32>
    %cst_4 = arith.constant dense<0.000000e+00> : vector<16xf32>
    %10 = vector.multi_reduction <add>, %9, %cst_4 [1] : vector<16x722xf32> to vector<16xf32>
    %11 = vector.shape_cast %10 : vector<16xf32> to vector<16x1xf32>
    %12 = math.log %11 : vector<16x1xf32>
    %13 = tpu.iota {dimensions = array<i32: 1>} : vector<16x722xi32>
    %14 = vector.broadcast %4 : vector<16x1xi32> to vector<16x722xi32>
    %15 = arith.subi %13, %14 : vector<16x722xi32>
    %16 = math.absi %15 : vector<16x722xi32>
    %17 = arith.sitofp %16 : vector<16x722xi32> to vector<16x722xf32>
    %cst_5 = arith.constant 0.693147182 : f32
    %18 = vector.broadcast %cst_5 : f32 to vector<16x722xf32>
    %19 = arith.mulf %17, %18 : vector<16x722xf32>
    %20 = math.exp %19 : vector<16x722xf32>
    %cst_6 = arith.constant -2.500000e-01 : f32
    %21 = vector.broadcast %cst_6 : f32 to vector<16x722xf32>
    %22 = arith.mulf %21, %20 : vector<16x722xf32>
    %23 = math.exp %22 : vector<16x722xf32>
    %c0_i32_7 = arith.constant 0 : i32
    %24 = vector.broadcast %c0_i32_7 : i32 to vector<16x722xi32>
    %25 = arith.cmpi eq, %16, %24 : vector<16x722xi32>
    %c3_i32 = arith.constant 3 : i32
    %26 = vector.broadcast %c3_i32 : i32 to vector<16x722xi32>
    %27 = arith.cmpi sle, %16, %26 : vector<16x722xi32>
    %cst_8 = arith.constant 0.000000e+00 : f32
    %28 = vector.broadcast %cst_8 : f32 to vector<16x722xf32>
    %29 = arith.select %27, %23, %28 : vector<16x722xi1>, vector<16x722xf32>
    %cst_9 = arith.constant 1.000000e+00 : f32
    %30 = vector.broadcast %cst_9 : f32 to vector<16x722xf32>
    %31 = arith.select %25, %30, %29 : vector<16x722xi1>, vector<16x722xf32>
    %cst_10 = arith.constant dense<0.000000e+00> : vector<16xf32>
    %32 = vector.multi_reduction <add>, %31, %cst_10 [1] : vector<16x722xf32> to vector<16xf32>
    %33 = vector.shape_cast %32 : vector<16xf32> to vector<16x1xf32>
    %34 = arith.mulf %8, %31 : vector<16x722xf32>
    %cst_11 = arith.constant dense<0.000000e+00> : vector<16xf32>
    %35 = vector.multi_reduction <add>, %34, %cst_11 [1] : vector<16x722xf32> to vector<16xf32>
    %36 = vector.shape_cast %35 : vector<16xf32> to vector<16x1xf32>
    %37 = arith.mulf %12, %33 : vector<16x1xf32>
    %38 = arith.subf %37, %36 : vector<16x1xf32>
    %c1_i32 = arith.constant 1 : i32
    %39 = arith.muli %arg0, %c1_i32 : i32
    %40 = arith.addi %39, %arg1 : i32
    %c16_i32 = arith.constant 16 : i32
    %41 = arith.muli %40, %c16_i32 : i32
    %42 = tpu.iota {dimensions = array<i32: 0>} : vector<16x1xi32>
    %43 = vector.broadcast %41 : i32 to vector<16x1xi32>
    %44 = arith.addi %43, %42 : vector<16x1xi32>
    %c0_12 = arith.constant 0 : index
    %c0_13 = arith.constant 0 : index
    %45 = vector.load %arg5[%c0_12, %c0_13] : memref<16x1xf32, #tpu.memory_space<vmem>>, vector<16x1xf32>
    %c16_i32_14 = arith.constant 16 : i32
    %46 = vector.broadcast %c16_i32_14 : i32 to vector<16x1xi32>
    %47 = arith.cmpi slt, %44, %46 : vector<16x1xi32>
    %cst_15 = arith.constant 0.000000e+00 : f32
    %48 = vector.broadcast %cst_15 : f32 to vector<16x1xf32>
    %49 = arith.select %47, %38, %48 : vector<16x1xi1>, vector<16x1xf32>
    %50 = arith.addf %45, %49 : vector<16x1xf32>
    %c0_16 = arith.constant 0 : index
    %c0_17 = arith.constant 0 : index
    %51 = vector.load %arg5[%c0_16, %c0_17] : memref<16x1xf32, #tpu.memory_space<vmem>>, vector<16x1xf32>
    tpu.vector_store %arg5[%c0_16, %c0_17], %50 {strides = array<i32>} : memref<16x1xf32, #tpu.memory_space<vmem>>, vector<16x1xf32>,
    %c0_i32_18 = arith.constant 0 : i32
    %52 = arith.cmpi eq, %arg1, %c0_i32_18 : i32
    %53 = arith.extui %52 : i1 to i32
    %c0_i32_19 = arith.constant 0 : i32
    %54 = arith.cmpi ne, %53, %c0_i32_19 : i32
    scf.if %54 {
      %c0_20 = arith.constant 0 : index
      %c0_21 = arith.constant 0 : index
      %55 = vector.load %arg5[%c0_20, %c0_21] : memref<16x1xf32, #tpu.memory_space<vmem>>, vector<16x1xf32>
      %56 = vector.shape_cast %55 : vector<16x1xf32> to vector<1x16x1xf32>
      %cst_22 = arith.constant dense<0.000000e+00> : vector<1xf32>
      %57 = vector.multi_reduction <add>, %56, %cst_22 [1, 2] : vector<1x16x1xf32> to vector<1xf32>
      %58 = vector.shape_cast %57 : vector<1xf32> to vector<1x1x1xf32>
      %59 = vector.extract %58[0, 0, 0] : f32 from vector<1x1x1xf32>
      %60 = vector.broadcast %59 : f32 to vector<1x1xf32>
      %61 = vector.shape_cast %60 : vector<1x1xf32> to vector<1x1x1xf32>
      %c0_23 = arith.constant 0 : index
      %c0_24 = arith.constant 0 : index
      %c0_25 = arith.constant 0 : index
      %62 = vector.load %arg4[%c0_23, %c0_24, %c0_25] : memref<1x1x1xf32, #tpu.memory_space<vmem>>, vector<1x1x1xf32>
      tpu.vector_store %arg4[%c0_23, %c0_24, %c0_25], %61 {strides = array<i32>} : memref<1x1x1xf32, #tpu.memory_space<vmem>>, vector<1x1x1xf32>,
    } else {
    }
    return
  }
  func.func @transform_0(%arg0: i32, %arg1: i32) -> (i32, i32) {
    %c1_i32 = arith.constant 1 : i32
    %0 = arith.muli %arg0, %c1_i32 : i32
    %1 = arith.addi %0, %arg1 : i32
    %c0_i32 = arith.constant 0 : i32
    %2 = arith.minsi %1, %c0_i32 : i32
    %c0_i32_0 = arith.constant 0 : i32
    %c0_i32_1 = arith.constant 0 : i32
    return %2, %c0_i32_0 : i32, i32
  }
  func.func @transform_1(%arg0: i32, %arg1: i32) -> (i32, i32) {
    %c1_i32 = arith.constant 1 : i32
    %0 = arith.muli %arg0, %c1_i32 : i32
    %1 = arith.addi %0, %arg1 : i32
    %c0_i32 = arith.constant 0 : i32
    %2 = arith.minsi %1, %c0_i32 : i32
    %c0_i32_0 = arith.constant 0 : i32
    %c0_i32_1 = arith.constant 0 : i32
    return %2, %c0_i32_0 : i32, i32
  }
  func.func @transform_2(%arg0: i32, %arg1: i32) -> (i32, i32, i32) {
    %c0_i32 = arith.constant 0 : i32
    %c0_i32_0 = arith.constant 0 : i32
    %c0_i32_1 = arith.constant 0 : i32
    return %arg0, %c0_i32, %c0_i32_0 : i32, i32, i32
  }
}

</mosaic_0001>

<bundles_post_ra>
// kernel: tpu_custom_call.1
= control target key start
LH: loop header
LB: loop body
LE: loop exit
PB: predicated region body
PF: predicated region fallthrough
CT: control target
= control target key end

     0   :  { %7 = vsyncpa [#allocation4], 0  ;;  %s846_s0 = inlined_call_operand.hbm [shape: f32[16,722], index: 0, kind: input, shape index: {}]   ;;  %s847_s1 = inlined_call_operand.vmem [shape: s32[16,1], index: 1, kind: input, shape index: {}]   ;;  %s848_s2 = inlined_call_operand.hbm [shape: f32[1,1,1], index: 2, kind: output, shape index: {}]  }
   0x1   :  { %8 = vsyncpa [#allocation5], 0  ;;  %s611_s9 = smov [#allocation3]   ;;  %s563_s13 = scalar_lea.hbm %s846_s0, 1536 }
   0x2   :  { %s21_s10 = sshll.u32 %s611_s9, 4  ;;  %p564_p0 = scmp.ne.s32.totalorder %s846_s0, %s563_s13  ;;  %s22_s10 = int_to_ptr.vmem [resolvable:$true] %s21_s10 }
   0x3   :  { %p567_p1 = scmp.lt.u32.totalorder %s563_s13, %s846_s0 }
   0x5   :  { %p569_p2 = pnand %p567_p1, %p564_p0 }
   0x7   :  { %572 = shalt.err (!%p569_p2)
}
   0x8   :  { %s573_s18 = scalar_lea.vmem %s22_s10, 1536  ;;  %p578_p4 = scmp.lt.s32.totalorder %s22_s10, %s22_s10 }
   0x9   :  { %p574_p3 = scmp.ne.s32.totalorder %s22_s10, %s573_s18  ;;  %p579_p5 = scmp.lt.s32.totalorder %s573_s18, %s573_s18 }
   0xb   :  { %p580_p6 = por %p579_p5, %p578_p4 }
   0xd   :  { %p581_p7 = pnand %p580_p6, %p574_p3 }
   0xf   :  { %584 = shalt.err (!%p581_p7)
}
  0x10   :  { %s612_s19 = smov 768   ;;  %s613_s20 = smov 48  }
  0x11   :  { %27 = dma.hbm_to_vmem [thread:$0]  %s846_s0, 1536, %s22_s10, [#allocation4], %s612_s19, %s612_s19, %s613_s20  }
  0x12   :  { %607 = dma.done.wait [#allocation4], 1536  }
  0x13   :  { %608 = vsyncadd [#allocation4], 4294965760  ;;  %v614_v0 = vmov 0   ;;  %v88_v1 = vld [vmem:[%s847_s1] sm:$0xff]  ;;  %v89_v2 = vld [vmem:[%s847_s1 + $0x8] sm:$0xff]  ;;  %vm93_vm0 = vcmask 670720   ;;  %v163_v27 = vlaneseq }
  0x14   :  { %486 = vset.pattern.permute.xlu0 %v614_v0  ;;  %v650_v3 = vld [vmem:[#allocation3] sm:$0xff]  ;;  %v652_v4 = vld [vmem:[#allocation3 + $0x8] sm:$0xff]  ;;  %v654_v5 = vld [vmem:[#allocation3 + $0x10] sm:$0xff]  ;;  %s616_s0 = smov [#allocation6]  }
  0x15   :  { %171 = vperm.xlu0 %486, %v88_v1   ;;  %v656_v6 = vld [vmem:[#allocation3 + $0x18] sm:$0xff]  ;;  %v658_v7 = vld [vmem:[#allocation3 + $0x20] sm:$0xff]  ;;  %v660_v8 = vld [vmem:[#allocation3 + $0x28] sm:$0xff]  ;;  %v90_v9 = vmax.f32 %v650_v3, %v654_v5  ;;  %v164_v28 = vand.u32 127, %v163_v27  ;;  %s449_s1 = sshll.u32 %s616_s0, 4  ;;  %s450_s1 = int_to_ptr.vmem [resolvable:$true] %s449_s1 }
  0x16   :  { %v91_v10 = vmax.f32 %v652_v4, %v656_v6  ;;  %v666_v11 = vld [vmem:[#allocation3 + $0x30] sm:$0xff]  ;;  %v94_v12 = vsel %vm93_vm0, %v660_v8, -inf  ;;  %v670_v13 = vld [vmem:[#allocation3 + $0x38] sm:$0xff]  ;;  %v672_v14 = vld [vmem:[#allocation3 + $0x40] sm:$0xff]  ;;  %s585_s28 = scalar_lea.vmem %s450_s1, 16  ;;  %s589_s29 = scalar_lea.vmem %s450_s1, 32 }
  0x17   :  { %v674_v15 = vld [vmem:[#allocation3 + $0x48] sm:$0xff]  ;;  %v92_v16 = vmax.f32 %v90_v9, %v658_v7  ;;  %v677_v18 = vld [vmem:[#allocation3 + $0x50] sm:$0xff]  ;;  %v679_v19 = vld [vmem:[#allocation3 + $0x58] sm:$0xff]  ;;  %v99_v20 = vmax.f32 %v666_v11, %v672_v14  ;;  %v165_v29 = vadd.s32 128, %v164_v28  ;;  %v166_v30 = vadd.s32 256, %v164_v28  ;;  %p586_p8 = scmp.ne.s32.totalorder %s450_s1, %s585_s28  ;;  %p590_p9 = scmp.lt.s32.totalorder %s450_s1, %s450_s1 }
  0x18   :  { %v95_v17 = vmax.f32 %v91_v10, %v94_v12  ;;  %v100_v21 = vmax.f32 %v670_v13, %v674_v15  ;;  %v102_v22 = vsel %vm93_vm0, %v679_v19, -inf  ;;  %v167_v31 = vadd.s32 384, %v164_v28  ;;  %p591_p10 = scmp.lt.s32.totalorder %s589_s29, %s585_s28 }
  0x19   :  { %174 = vperm.xlu0 %486, %v89_v2   ;;  %v101_v24 = vmax.f32 %v99_v20, %v677_v18  ;;  %v168_v32 = vadd.s32 512, %v164_v28  ;;  %v688_v33 = vadd.s32 640, %v164_v28 }
  0x1a   :  { %v96_v23 = vmax.f32 %v92_v16, %v95_v17  ;;  %v103_v25 = vmax.f32 %v100_v21, %v102_v22  ;;  %p592_p11 = por %p591_p10, %p590_p9 }
  0x1c   :  { %97 = vmax.xlane.f32.xlu1 %v96_v23  ;;  %v104_v26 = vmax.f32 %v101_v24, %v103_v25  ;;  %p593_p12 = pnand %p592_p11, %p586_p8 }
  0x20   :  { %105 = vmax.xlane.f32.xlu1 %v104_v26 }
  0x94   :  { %v172_v34 = vpop.permute.xlu0 %171 }
  0x95   :  { %v176_v35 = vsub.s32 %v164_v28, %v172_v34  ;;  %v177_v36 = vsub.s32 %v165_v29, %v172_v34  ;;  %v178_v37 = vsub.s32 %v166_v30, %v172_v34  ;;  %v179_v38 = vsub.s32 %v167_v31, %v172_v34 }
  0x96   :  { %v180_v39 = vsub.s32 %v168_v32, %v172_v34  ;;  %v181_v40 = vsub.s32 %v688_v33, %v172_v34 }
  0x97   :  { %v189_v41 = vsub.s32 0, %v176_v35  ;;  %v192_v42 = vsub.s32 0, %v177_v36  ;;  %v195_v43 = vsub.s32 0, %v178_v37  ;;  %v198_v44 = vsub.s32 0, %v179_v38 }
  0x98   :  { %v175_v45 = vpop.permute.xlu0 %174  ;;  %v201_v52 = vsub.s32 0, %v180_v39  ;;  %v204_v53 = vsub.s32 0, %v181_v40 }
  0x99   :  { %v691_v46 = vmin.u32 %v189_v41, %v176_v35  ;;  %v693_v47 = vmin.u32 %v192_v42, %v177_v36  ;;  %v695_v48 = vmin.u32 %v195_v43, %v178_v37  ;;  %v182_v49 = vsub.s32 %v164_v28, %v175_v45 }
  0x9a   :  { %v183_v50 = vsub.s32 %v165_v29, %v175_v45  ;;  %v184_v51 = vsub.s32 %v166_v30, %v175_v45  ;;  %v700_v60 = vmin.u32 %v198_v44, %v179_v38  ;;  %v708_v9 = vmin.u32 %v201_v52, %v180_v39 }
  0x9b   :  { %v224_v54 = vcvt.s32.f32 %v691_v46  ;;  %v225_v55 = vcvt.s32.f32 %v693_v47  ;;  %v226_v56 = vcvt.s32.f32 %v695_v48  ;;  %v207_v57 = vsub.s32 0, %v182_v49 }
  0x9c   :  { %v210_v58 = vsub.s32 0, %v183_v50  ;;  %v213_v59 = vsub.s32 0, %v184_v51  ;;  %v710_v10 = vmin.u32 %v204_v53, %v181_v40  ;;  %v227_v20 = vcvt.s32.f32 %v700_v60 }
  0x9d   :  { %v236_v61 = vmul.f32 0.6931472, %v224_v54  ;;  %v237_v62 = vmul.f32 0.6931472, %v225_v55  ;;  %v238_v63 = vmul.f32 0.6931472, %v226_v56  ;;  %v702_v0 = vmin.u32 %v207_v57, %v182_v49 }
  0x9e   :  { %v704_v1 = vmin.u32 %v210_v58, %v183_v50  ;;  %v706_v2 = vmin.u32 %v213_v59, %v184_v51  ;;  %v228_v21 = vcvt.s32.f32 %v708_v9  ;;  %v229_v25 = vcvt.s32.f32 %v710_v10 }
  0x9f   :  { %v230_v12 = vcvt.s32.f32 %v702_v0  ;;  %v248_v16 = vmul.f32 1.442695, %v236_v61  ;;  %v250_v22 = vmul.f32 1.442695, %v237_v62  ;;  %v252_v26 = vmul.f32 1.442695, %v238_v63 }
  0xa0   :  { %v231_v17 = vcvt.s32.f32 %v704_v1  ;;  %v232_v23 = vcvt.s32.f32 %v706_v2  ;;  %v239_v27 = vmul.f32 0.6931472, %v227_v20  ;;  %v240_v29 = vmul.f32 0.6931472, %v228_v21 }
  0xa1   :  { %v242_v24 = vmul.f32 0.6931472, %v230_v12  ;;  %v241_v30 = vmul.f32 0.6931472, %v229_v25  ;;  %487 = vpow2.f32 %v248_v16  ;;  %v185_v36 = vsub.s32 %v167_v31, %v175_v45 }
  0xa2   :  { %v243_v34 = vmul.f32 0.6931472, %v231_v17  ;;  %v254_v35 = vmul.f32 1.442695, %v239_v27  ;;  %489 = vpow2.f32 %v250_v22  ;;  %v244_v37 = vmul.f32 0.6931472, %v232_v23 }
  0xa3   :  { %v260_v28 = vmul.f32 1.442695, %v242_v24  ;;  %v256_v38 = vmul.f32 1.442695, %v240_v29  ;;  %491 = vpow2.f32 %v252_v26  ;;  %v258_v39 = vmul.f32 1.442695, %v241_v30 }
  0xa4   :  { %v186_v40 = vsub.s32 %v168_v32, %v175_v45  ;;  %v262_v41 = vmul.f32 1.442695, %v243_v34  ;;  %v216_v42 = vsub.s32 0, %v185_v36  ;;  %v264_v43 = vmul.f32 1.442695, %v244_v37 }
  0xa5   :  { %493 = vpow2.f32 %v260_v28  ;;  %v187_v52 = vsub.s32 %v688_v33, %v175_v45  ;;  %vm308_vm1 = vcmp.eq.s32.totalorder %v691_v46, 0  ;;  %vm309_vm2 = vcmp.eq.s32.totalorder %v693_v47, 0 }
  0xa6   :  { %495 = vpow2.f32 %v254_v35  ;;  %v219_v54 = vsub.s32 0, %v186_v40  ;;  %vm320_vm3 = vcmp.le.s32.totalorder %v691_v46, 3  ;;  %vm321_vm4 = vcmp.le.s32.totalorder %v693_v47, 3 }
  0xa7   :  { %497 = vpow2.f32 %v256_v38  ;;  %vm322_vm5 = vcmp.le.s32.totalorder %v695_v48, 3  ;;  %vm323_vm6 = vcmp.le.s32.totalorder %v700_v60, 3  ;;  %vm310_vm7 = vcmp.eq.s32.totalorder %v695_v48, 0 }
  0xa8   :  { %499 = vpow2.f32 %v258_v39  ;;  %v759_v63 = vmin.u32 %v219_v54, %v186_v40  ;;  %vm311_vm8 = vcmp.eq.s32.totalorder %v700_v60, 0  ;;  %vm324_vm9 = vcmp.le.s32.totalorder %v708_v9, 3 }
  0xa9   :  { %v98_v44 = vpop.xlane.xlu1 %97  ;;  %501 = vpow2.f32 %v262_v41  ;;  %vm325_vm10 = vcmp.le.s32.totalorder %v710_v10, 3  ;;  %vm312_vm11 = vcmp.eq.s32.totalorder %v708_v9, 0  ;;  %vm313_vm12 = vcmp.eq.s32.totalorder %v710_v10, 0 }
  0xaa   :  { %v719_v49 = vsub.f32 %v650_v3, %v98_v44  ;;  %v722_v50 = vsub.f32 %v652_v4, %v98_v44  ;;  %v725_v31 = vsub.f32 %v654_v5, %v98_v44  ;;  %v728_v51 = vsub.f32 %v656_v6, %v98_v44 }
  0xab   :  { %v731_v32 = vsub.f32 %v658_v7, %v98_v44  ;;  %503 = vpow2.f32 %v264_v43  ;;  %v738_v6 = vmin.u32 %v216_v42, %v185_v36  ;;  %v488_v56 = vpop.eup %487  ;;  %v741_v7 = vsub.f32 %v660_v8, %v98_v44 }
  0xac   :  { %v119_v53 = vmul.f32 1.442695, %v719_v49  ;;  %v121_v3 = vmul.f32 1.442695, %v722_v50  ;;  %v123_v4 = vmul.f32 1.442695, %v725_v31  ;;  %v490_v57 = vpop.eup %489  ;;  %v234_v36 = vcvt.s32.f32 %v759_v63 }
  0xad   :  { %v125_v5 = vmul.f32 1.442695, %v728_v51  ;;  %v106_v55 = vpop.xlane.xlu1 %105  ;;  %v127_v33 = vmul.f32 1.442695, %v731_v32  ;;  %v492_v62 = vpop.eup %491  ;;  %v273_v22 = vmul.f32 -0.25, %v490_v57  ;;  %v233_v25 = vcvt.s32.f32 %v738_v6 }
  0xae   :  { %505 = vpow2.f32 %v119_v53  ;;  %v745_v45 = vsub.f32 %v666_v11, %v106_v55  ;;  %v748_v58 = vsub.f32 %v670_v13, %v106_v55  ;;  %v751_v59 = vsub.f32 %v672_v14, %v106_v55 }
  0xaf   :  { %507 = vpow2.f32 %v121_v3  ;;  %v754_v61 = vsub.f32 %v674_v15, %v106_v55  ;;  %v757_v8 = vsub.f32 %v677_v18, %v106_v55  ;;  %v222_v11 = vsub.s32 0, %v187_v52  ;;  %v494_v12 = vpop.eup %493 }
  0xb0   :  { %509 = vpow2.f32 %v123_v4  ;;  %v762_v16 = vsub.f32 %v679_v19, %v106_v55  ;;  %v131_v13 = vmul.f32 1.442695, %v745_v45  ;;  %v133_v14 = vmul.f32 1.442695, %v748_v58  ;;  %v496_v17 = vpop.eup %495 }
  0xb1   :  { %511 = vpow2.f32 %v125_v5  ;;  %v272_v15 = vmul.f32 -0.25, %v488_v56  ;;  %v135_v20 = vmul.f32 1.442695, %v751_v59  ;;  %v137_v18 = vmul.f32 1.442695, %v754_v61  ;;  %v498_v21 = vpop.eup %497 }
  0xb2   :  { %513 = vpow2.f32 %v127_v33  ;;  %v139_v23 = vmul.f32 1.442695, %v757_v8  ;;  %v129_v24 = vmul.f32 1.442695, %v741_v7  ;;  %v274_v19 = vmul.f32 -0.25, %v492_v62  ;;  %v500_v26 = vpop.eup %499 }
  0xb3   :  { %515 = vpow2.f32 %v131_v13  ;;  %v141_v27 = vmul.f32 1.442695, %v762_v16  ;;  %v275_v28 = vmul.f32 -0.25, %v496_v17  ;;  %v772_v29 = vmin.u32 %v222_v11, %v187_v52  ;;  %v502_v30 = vpop.eup %501 }
  0xb4   :  { %517 = vpow2.f32 %v133_v14  ;;  %v276_v34 = vmul.f32 -0.25, %v498_v21  ;;  %v284_v35 = vmul.f32 1.442695, %v272_v15  ;;  %v277_v38 = vmul.f32 -0.25, %v500_v26 }
  0xb5   :  { %519 = vpow2.f32 %v135_v20  ;;  %v504_v37 = vpop.eup %503  ;;  %v286_v39 = vmul.f32 1.442695, %v273_v22  ;;  %v235_v40 = vcvt.s32.f32 %v772_v29  ;;  %v288_v42 = vmul.f32 1.442695, %v274_v19 }
  0xb6   :  { %521 = vpow2.f32 %v137_v18  ;;  %v245_v43 = vmul.f32 0.6931472, %v233_v25  ;;  %v290_v52 = vmul.f32 1.442695, %v275_v28  ;;  %v246_v53 = vmul.f32 0.6931472, %v234_v36 }
  0xb7   :  { %523 = vpow2.f32 %v139_v23  ;;  %v292_v4 = vmul.f32 1.442695, %v276_v34  ;;  %v247_v5 = vmul.f32 0.6931472, %v235_v40  ;;  %v278_v56 = vmul.f32 -0.25, %v494_v12 }
  0xb8   :  { %v506_v41 = vpop.eup %505  ;;  %525 = vpow2.f32 %v129_v24  ;;  %v294_v33 = vmul.f32 1.442695, %v277_v38  ;;  %v279_v62 = vmul.f32 -0.25, %v502_v30  ;;  %v266_v13 = vmul.f32 1.442695, %v245_v43 }
  0xb9   :  { %v508_v44 = vpop.eup %507  ;;  %527 = vpow2.f32 %v141_v27  ;;  %v268_v17 = vmul.f32 1.442695, %v246_v53  ;;  %v270_v18 = vmul.f32 1.442695, %v247_v5  ;;  %v280_v23 = vmul.f32 -0.25, %v504_v37 }
  0xba   :  { %v510_v3 = vpop.eup %509  ;;  %v143_v54 = vadd.f32 %v508_v44, %v506_v41  ;;  %529 = vpow2.f32 %v284_v35  ;;  %v296_v24 = vmul.f32 1.442695, %v278_v56  ;;  %v298_v25 = vmul.f32 1.442695, %v279_v62 }
  0xbb   :  { %v512_v55 = vpop.eup %511  ;;  %531 = vpow2.f32 %v286_v39  ;;  %v300_v36 = vmul.f32 1.442695, %v280_v23  ;;  %vm326_vm13 = vcmp.le.s32.totalorder %v702_v0, 3  ;;  %vm327_vm14 = vcmp.le.s32.totalorder %v704_v1, 3 }
  0xbc   :  { %v514_v57 = vpop.eup %513  ;;  %v144_v11 = vadd.f32 %v510_v3, %v143_v54  ;;  %533 = vpow2.f32 %v288_v42  ;;  %vm314_vm15 = vcmp.eq.s32.totalorder %v702_v0, 0 }
  0xbd   :  { %v516_v14 = vpop.eup %515  ;;  %535 = vpow2.f32 %v290_v52 }
  0xbe   :  { %v518_v15 = vpop.eup %517  ;;  %v145_v20 = vadd.f32 %v512_v55, %v144_v11  ;;  %537 = vpow2.f32 %v292_v4 }
  0xbf   :  { %v520_v21 = vpop.eup %519  ;;  %v151_v22 = vadd.f32 %v518_v15, %v516_v14  ;;  %539 = vpow2.f32 %v294_v33 }
  0xc0   :  { %v522_v12 = vpop.eup %521  ;;  %v146_v19 = vadd.f32 %v514_v57, %v145_v20  ;;  %541 = vpow2.f32 %v266_v13 }
  0xc1   :  { %v524_v26 = vpop.eup %523  ;;  %v152_v27 = vadd.f32 %v520_v21, %v151_v22  ;;  %543 = vpow2.f32 %v268_v17 }
  0xc2   :  { %v526_v28 = vpop.eup %525  ;;  %545 = vpow2.f32 %v270_v18 }
  0xc3   :  { %v528_v30 = vpop.eup %527  ;;  %v147_v34 = vsel %vm93_vm0, %v526_v28, 0.0  ;;  %v153_v35 = vadd.f32 %v522_v12, %v152_v27  ;;  %547 = vpow2.f32 %v296_v24 }
  0xc4   :  { %v530_v38 = vpop.eup %529  ;;  %v148_v37 = vadd.f32 %v147_v34, %v146_v19  ;;  %549 = vpow2.f32 %v298_v25  ;;  %v155_v43 = vsel %vm93_vm0, %v528_v30, 0.0 }
  0xc5   :  { %v532_v39 = vpop.eup %531  ;;  %v154_v40 = vadd.f32 %v524_v26, %v153_v35  ;;  %v332_v41 = vsel %vm320_vm3, %v530_v38, 0.0  ;;  %551 = vpow2.f32 %v300_v36  ;;  %vm316_vm3 = vcmp.eq.s32.totalorder %v706_v2, 0 }
  0xc6   :  { %v534_v42 = vpop.eup %533  ;;  %149 = vadd.xlane.f32.xlu0 %v148_v37  ;;  %v333_v44 = vsel %vm321_vm4, %v532_v39, 0.0  ;;  %v344_v52 = vsel %vm308_vm1, 1.0, %v332_v41  ;;  %vm315_vm1 = vcmp.eq.s32.totalorder %v704_v1, 0  ;;  %vm317_vm4 = vcmp.eq.s32.totalorder %v738_v6, 0 }
  0xc7   :  { %v536_v53 = vpop.eup %535  ;;  %v156_v3 = vadd.f32 %v155_v43, %v154_v40  ;;  %v334_v54 = vsel %vm322_vm5, %v534_v42, 0.0  ;;  %v345_v4 = vsel %vm309_vm2, 1.0, %v333_v44  ;;  %v372_v23 = vmul.f32 %v344_v52, %v719_v49 }
  0xc8   :  { %v538_v5 = vpop.eup %537  ;;  %v335_v55 = vsel %vm323_vm6, %v536_v53, 0.0  ;;  %v356_v56 = vadd.f32 %v345_v4, %v344_v52  ;;  %v346_v46 = vsel %vm310_vm7, 1.0, %v334_v54  ;;  %v373_v25 = vmul.f32 %v345_v4, %v722_v50 }
  0xc9   :  { %v540_v33 = vpop.eup %539  ;;  %157 = vadd.xlane.f32.xlu1 %v156_v3  ;;  %v336_v47 = vsel %vm324_vm9, %v538_v5, 0.0  ;;  %v347_v48 = vsel %vm311_vm8, 1.0, %v335_v55  ;;  %vm328_vm2 = vcmp.le.s32.totalorder %v706_v2, 3  ;;  %v374_v0 = vmul.f32 %v346_v46, %v725_v31 }
  0xca   :  { %v542_v57 = vpop.eup %541  ;;  %v337_v62 = vsel %vm325_vm10, %v540_v33, 0.0  ;;  %v357_v11 = vadd.f32 %v356_v56, %v346_v46  ;;  %v348_v21 = vsel %vm312_vm11, 1.0, %v336_v47  ;;  %v384_v50 = vadd.f32 %v373_v25, %v372_v23 }
  0xcb   :  { %v544_v13 = vpop.eup %543  ;;  %v281_v14 = vmul.f32 -0.25, %v542_v57  ;;  %v795_v60 = vsel %vm313_vm12, 1.0, %v337_v62  ;;  %vm318_vm5 = vcmp.eq.s32.totalorder %v759_v63, 0  ;;  %vm329_vm6 = vcmp.le.s32.totalorder %v738_v6, 3 }
  0xcc   :  { %v546_v17 = vpop.eup %545  ;;  %v358_v15 = vadd.f32 %v357_v11, %v347_v48  ;;  %v282_v20 = vmul.f32 -0.25, %v544_v13  ;;  %v360_v26 = vsel %vm93_vm0, %v795_v60, 0.0  ;;  %v385_v41 = vadd.f32 %v384_v50, %v374_v0 }
  0xcd   :  { %v548_v18 = vpop.eup %547  ;;  %v283_v9 = vmul.f32 -0.25, %v546_v17  ;;  %v302_v22 = vmul.f32 1.442695, %v281_v14  ;;  %vm330_vm7 = vcmp.le.s32.totalorder %v759_v63, 3  ;;  %vm319_vm8 = vcmp.eq.s32.totalorder %v772_v29, 0 }
  0xce   :  { %v550_v24 = vpop.eup %549  ;;  %v359_v12 = vadd.f32 %v358_v15, %v348_v21  ;;  %v304_v10 = vmul.f32 1.442695, %v282_v20  ;;  %v338_v19 = vsel %vm326_vm13, %v548_v18, 0.0  ;;  %vm331_vm9 = vcmp.le.s32.totalorder %v772_v29, 3 }
  0xcf   :  { %553 = vpow2.f32 %v302_v22  ;;  %v306_v27 = vmul.f32 1.442695, %v283_v9  ;;  %v339_v28 = vsel %vm327_vm14, %v550_v24, 0.0  ;;  %v552_v34 = vpop.eup %551  ;;  %v350_v49 = vsel %vm314_vm15, 1.0, %v338_v19 }
  0xd0   :  { %v361_v30 = vadd.f32 %v360_v26, %v359_v12  ;;  %555 = vpow2.f32 %v304_v10  ;;  %v351_v35 = vsel %vm315_vm1, 1.0, %v339_v28  ;;  %v340_v36 = vsel %vm328_vm2, %v552_v34, 0.0 }
  0xd1   :  { %557 = vpow2.f32 %v306_v27  ;;  %v364_v38 = vadd.f32 %v351_v35, %v350_v49  ;;  %v378_v37 = vmul.f32 %v350_v49, %v745_v45  ;;  %v379_v39 = vmul.f32 %v351_v35, %v748_v58 }
  0xd2   :  { %362 = vadd.xlane.f32.xlu1 %v361_v30  ;;  %v352_v40 = vsel %vm316_vm3, 1.0, %v340_v36  ;;  %v375_v58 = vmul.f32 %v347_v48, %v728_v51  ;;  %v376_v51 = vmul.f32 %v348_v21, %v731_v32  ;;  %v377_v29 = vmul.f32 %v795_v60, %v741_v7 }
  0xd3   :  { %v365_v1 = vadd.f32 %v364_v38, %v352_v40  ;;  %v392_v42 = vadd.f32 %v379_v39, %v378_v37  ;;  %v380_v2 = vmul.f32 %v352_v40, %v751_v59  ;;  %vm73_vm10 = vcmask 7168  }
  0xd4   :  { %v386_v4 = vadd.f32 %v385_v41, %v375_v58  ;;  %v388_v63 = vsel %vm93_vm0, %v377_v29, 0.0  ;;  %v615_v14 = vmov 0.0  }
  0xd5   :  { %v393_v5 = vadd.f32 %v392_v42, %v380_v2  ;;  %74 = vst.msk [vmem:[#allocation2] sm:$0xff] %vm73_vm10, %v615_v14  ;;  %75 = vst.msk [vmem:[#allocation2 + $0x8] sm:$0xff] %vm73_vm10, %v615_v14 }
  0xd6   :  { %v387_v57 = vadd.f32 %v386_v4, %v376_v51 }
  0xd8   :  { %v389_v13 = vadd.f32 %v388_v63, %v387_v57 }
  0xd9   :  { %v554_v43 = vpop.eup %553 }
  0xda   :  { %v556_v44 = vpop.eup %555  ;;  %v341_v45 = vsel %vm329_vm6, %v554_v43, 0.0 }
  0xdb   :  { %v558_v31 = vpop.eup %557  ;;  %v342_v52 = vsel %vm330_vm7, %v556_v44, 0.0  ;;  %v353_v53 = vsel %vm317_vm4, 1.0, %v341_v45 }
  0xdc   :  { %v343_v3 = vsel %vm331_vm9, %v558_v31, 0.0  ;;  %v366_v54 = vadd.f32 %v365_v1, %v353_v53  ;;  %v354_v6 = vsel %vm318_vm5, 1.0, %v342_v52  ;;  %v381_v59 = vmul.f32 %v353_v53, %v754_v61  ;;  %v412_v22 = vld [vmem:[#allocation2] sm:$0xff]  ;;  %v413_v19 = vld [vmem:[#allocation2 + $0x8] sm:$0xff] }
  0xdd   :  { %v355_v55 = vsel %vm319_vm8, 1.0, %v343_v3  ;;  %v382_v62 = vmul.f32 %v354_v6, %v757_v8 }
  0xde   :  { %v367_v56 = vadd.f32 %v366_v54, %v354_v6  ;;  %v368_v33 = vsel %vm93_vm0, %v355_v55, 0.0  ;;  %v394_v47 = vadd.f32 %v393_v5, %v381_v59  ;;  %v383_v11 = vmul.f32 %v355_v55, %v762_v16 }
  0xe0   :  { %v369_v46 = vadd.f32 %v368_v33, %v367_v56  ;;  %v395_v48 = vadd.f32 %v394_v47, %v382_v62  ;;  %v396_v32 = vsel %vm93_vm0, %v383_v11, 0.0  ;;  %vm441_vm0 = vcmask 0  }
  0xe2   :  { %370 = vadd.xlane.f32.xlu1 %v369_v46  ;;  %v397_v61 = vadd.f32 %v396_v32, %v395_v48 }
  0xe6   :  { %390 = vadd.xlane.f32.xlu1 %v389_v13 }
  0xea   :  { %398 = vadd.xlane.f32.xlu1 %v397_v61 }
 0x153   :  { %v150_v7 = vpop.xlane.xlu0 %149 }
 0x154   :  { %559 = vlog2.f32 %v150_v7 }
 0x156   :  { %v158_v8 = vpop.xlane.xlu1 %157 }
 0x157   :  { %561 = vlog2.f32 %v158_v8 }
 0x15e   :  { %v560_v17 = vpop.eup %559 }
 0x15f   :  { %v363_v60 = vpop.xlane.xlu1 %362  ;;  %v160_v16 = vmul.f32 0.6931472, %v560_v17 }
 0x161   :  { %v562_v15 = vpop.eup %561  ;;  %v400_v18 = vmul.f32 %v363_v60, %v160_v16 }
 0x162   :  { %v162_v21 = vmul.f32 0.6931472, %v562_v15 }
 0x16f   :  { %v371_v20 = vpop.xlane.xlu1 %370 }
 0x170   :  { %v401_v23 = vmul.f32 %v371_v20, %v162_v21 }
 0x173   :  { %v391_v9 = vpop.xlane.xlu1 %390 }
 0x174   :  { %v402_v24 = vsub.f32 %v400_v18, %v391_v9 }
 0x176   :  { %v418_v12 = vadd.f32 %v412_v22, %v402_v24 }
 0x177   :  { %v399_v10 = vpop.xlane.xlu1 %398 }
 0x178   :  { %421 = vst.msk [vmem:[#allocation2] sm:$0xff] %vm73_vm10, %v418_v12  ;;  %v403_v25 = vsub.f32 %v401_v23, %v399_v10 }
 0x17a   :  { %v419_v26 = vadd.f32 %v413_v19, %v403_v25 }
 0x17c   :  { %422 = vst.msk [vmem:[#allocation2 + $0x8] sm:$0xff] %vm73_vm10, %v419_v26 }
 0x17f   :  { %v426_v27 = vld [vmem:[#allocation2] sm:$0xff] }
 0x180   :  { %v428_v30 = vsel %vm73_vm10, %v426_v27, 0.0 }
 0x183   :  { %v427_v28 = vld [vmem:[#allocation2 + $0x8] sm:$0xff] }
 0x184   :  { %v429_v34 = vsel %vm73_vm10, %v427_v28, 0.0 }
 0x185   :  { %v430_v49 = vadd.f32 %v429_v34, %v428_v30 }
 0x187   :  { %431 = vadd.xlane.f32.xlu1 %v430_v49 }
 0x214   :  { %v432_v35 = vpop.xlane.xlu1 %431 }
 0x215   :  { %v433_v50 = vrot.slane %v432_v35, 4 }
 0x217   :  { %v434_v36 = vadd.f32 %v433_v50, %v432_v35 }
 0x219   :  { %v435_v38 = vrot.slane %v434_v36, 2 }
 0x21b   :  { %v436_v37 = vadd.f32 %v435_v38, %v434_v36 }
 0x21d   :  { %v437_v39 = vrot.slane %v436_v37, 1 }
 0x21f   :  { %v438_v0 = vadd.f32 %v437_v39, %v436_v37 }
 0x221   :  { %478 = vpush %v438_v0 }
 0x252   :  { %s479_s27 = spop %478 }
 0x253   :  { %v440_v40 = vstv %s479_s27 }
 0x254   :  { %442 = vst.msk [vmem:[#allocation6] sm:$0x1] %vm441_vm0, %v440_v40 }
 0x255   :  { %596 = shalt.err (!%p593_p12)
}
 0x256   :  { %s597_s4 = scalar_lea.hbm %s848_s2, 16 }
 0x257   :  { %p598_p13 = scmp.ne.s32.totalorder %s848_s2, %s597_s4  ;;  %p601_p0 = scmp.lt.u32.totalorder %s597_s4, %s848_s2 }
 0x259   :  { %p603_p1 = pnand %p601_p0, %p598_p13 }
 0x25b   :  { %606 = shalt.err (!%p603_p1)
}
 0x25c   :  { %452 = dma.vmem_to_hbm [thread:$0]  %s450_s1, 16, %s848_s2, [#allocation5]  }
 0x25d   :  { %609 = dma.done.wait [#allocation5], 16  }
 0x25e   :  { %610 = vsyncadd [#allocation5], 4294967280 }
 0x25f   :  { %456 = vsyncpa [#allocation4], 1 }
 0x260   :  { %457 = vsyncpa [#allocation5], 1 }

</bundles_post_ra>
